<compile_context>
chip_gen: v5e
topology: v5e:2x2
jax: 0.10.0
libtpu: 0.0.40
codegen_flags: <defaults>
</compile_context>

<pallas_src>
import functools

import jax
import jax.numpy as jnp
from jax.experimental import pallas as pl
from jax.experimental.pallas import tpu as pltpu

_LANE = 128
_SUBLANE = 8


def _round_up(x, m):
    return (x + m - 1) // m * m


# ---------------------------------------------------------------------------
# Device / capability probes (cached; evaluated once per process).
# ---------------------------------------------------------------------------

@functools.lru_cache(maxsize=None)
def _vmem_budget_bytes():
    """~75% of physical VMEM: ~96 MiB on v5e/v6e (128 MiB), ~48 MiB on v7x
    (64 MiB per TensorCore).  Conservative 64 MiB default if the query fails."""
    phys = 64 * 2**20
    try:
        info = pltpu.get_tpu_info()
        phys = int(getattr(info, "vmem_capacity_bytes", phys)) or phys
    except Exception:
        pass
    phys = min(max(phys, 32 * 2**20), 128 * 2**20)
    return (phys * 3) // 4


@functools.lru_cache(maxsize=None)
def _buffered_one_supported():
    """Probe once whether BlockSpec(pipeline_mode=pl.Buffered(1)) is accepted
    by this jax/Mosaic version (tiny throwaway compile).  This replaces the
    previous try/except around the real kernel, which would not catch a
    lowering rejection under jit."""
    if not hasattr(pl, "Buffered"):
        return False

    def _copy_kernel(x_ref, o_ref):
        o_ref[...] = x_ref[...]

    try:
        fn = pl.pallas_call(
            _copy_kernel,
            out_shape=jax.ShapeDtypeStruct((2 * _SUBLANE, _LANE), jnp.float32),
            grid_spec=pltpu.PrefetchScalarGridSpec(
                num_scalar_prefetch=0,
                grid=(2,),
                in_specs=[pl.BlockSpec((_SUBLANE, _LANE), lambda i: (0, 0),
                                       pipeline_mode=pl.Buffered(1))],
                out_specs=pl.BlockSpec((_SUBLANE, _LANE), lambda i: (i, 0)),
            ),
        )
        jax.jit(fn).lower(jnp.zeros((_SUBLANE, _LANE), jnp.float32)).compile()
        return True
    except Exception:
        return False


# ---------------------------------------------------------------------------
# Kernels
# ---------------------------------------------------------------------------

def _pooler_kernel(x_ref, w_ref, b_ref, o_ref, *, compute_dtype):
    # x_ref: (tm, K)  row tile of flattened hidden_states (input dtype)
    # w_ref: (K, tn)  column tile of the pre-transposed weight (compute dtype)
    # b_ref: (1, tn)  f32 bias tile
    # o_ref: (tm, tn) output tile (lane-dense: tn is a multiple of 128)
    x = x_ref[...]
    if x.dtype != jnp.dtype(compute_dtype):
        x = x.astype(compute_dtype)          # bf16 MXU inputs, f32 accumulate
    y = jnp.dot(x, w_ref[...], preferred_element_type=jnp.float32)
    y = y + b_ref[...].astype(jnp.float32)
    o_ref[...] = jnp.tanh(y).astype(o_ref.dtype)


def _pooler_kernel_ksplit(x_ref, w_ref, b_ref, o_ref, acc_ref, *, compute_dtype):
    # K-tiled variant: accumulate partial products in an f32 VMEM scratch;
    # bias + tanh only on the last K step.  Grid = (gm, gk), K innermost.
    kk = pl.program_id(1)

    @pl.when(kk == 0)
    def _():
        acc_ref[...] = jnp.zeros_like(acc_ref)

    x = x_ref[...]
    if x.dtype != jnp.dtype(compute_dtype):
        x = x.astype(compute_dtype)
    acc_ref[...] += jnp.dot(x, w_ref[...], preferred_element_type=jnp.float32)

    @pl.when(kk == pl.num_programs(1) - 1)
    def _():
        y = acc_ref[...] + b_ref[...].astype(jnp.float32)
        o_ref[...] = jnp.tanh(y).astype(o_ref.dtype)


# ---------------------------------------------------------------------------
# Parameter preparation (run once, hoisted out of the per-call path)
# ---------------------------------------------------------------------------

def prepare_pooler_params(weight, bias, *, compute_dtype=jnp.bfloat16):
    """weight: (hidden_size, input_dim) (nn.Linear layout); bias: (hidden_size,).
    Returns (w_t, b2d, hidden_size) with w_t: (input_dim, n_pad) compute_dtype,
    b2d: (1, n_pad) float32, n_pad = round_up(hidden_size, 128)."""
    n, k = weight.shape
    n_pad = _round_up(n, _LANE)
    w_t = jnp.zeros((k, n_pad), compute_dtype).at[:, :n].set(
        weight.T.astype(compute_dtype))
    b2d = jnp.zeros((1, n_pad), jnp.float32).at[:, :n].set(
        bias.astype(jnp.float32).reshape(1, n))
    return w_t, b2d, n


# ---------------------------------------------------------------------------
# pallas_call builders
# ---------------------------------------------------------------------------

def _call_full_k(x_p, w_t, b2d, *, tm, tn, wb, out_dtype, compute_dtype,
                 vmem_limit_bytes):
    m_pad, k = x_p.shape
    n_pad2 = w_t.shape[1]
    gm = m_pad // tm
    gn = n_pad2 // tn

    # Weight / bias blocks depend only on the outer (N) index.  With gn == 1
    # they are constant for the whole call -> a single buffer saves VMEM
    # (matters on v7x).  With gn > 1 keep default double buffering so the next
    # column tile's weight DMA prefetches under the previous tile's tail.
    const_kwargs = (dict(pipeline_mode=pl.Buffered(1))
                    if (wb == 1 and gn == 1) else {})

    grid_spec = pltpu.PrefetchScalarGridSpec(
        num_scalar_prefetch=0,
        grid=(gn, gm),                                    # N outer, M inner
        in_specs=[
            pl.BlockSpec((tm, k), lambda j, i: (i, 0)),                  # x rows
            pl.BlockSpec((k, tn), lambda j, i: (0, j), **const_kwargs),  # W cols
            pl.BlockSpec((1, tn), lambda j, i: (0, j), **const_kwargs),  # bias
        ],
        out_specs=pl.BlockSpec((tm, tn), lambda j, i: (i, j)),
    )
    kernel = functools.partial(_pooler_kernel, compute_dtype=compute_dtype)
    return pl.pallas_call(
        kernel,
        out_shape=jax.ShapeDtypeStruct((m_pad, n_pad2), out_dtype),
        grid_spec=grid_spec,
        compiler_params=pltpu.CompilerParams(
            # M (rows) is the megacore-sharded axis; keeping N serial avoids
            # duplicating the dominant x HBM read across the two v7x cores.
            dimension_semantics=("arbitrary", "parallel"),
            vmem_limit_bytes=vmem_limit_bytes,
        ),
    )(x_p, w_t, b2d)


def _call_k_split(x_p, w_t, b2d, *, tm, tk, out_dtype, compute_dtype,
                  vmem_limit_bytes):
    m_pad, k_pad = x_p.shape
    n_pad = w_t.shape[1]
    gm = m_pad // tm
    gk = k_pad // tk

    grid_spec = pltpu.PrefetchScalarGridSpec(
        num_scalar_prefetch=0,
        grid=(gm, gk),                                    # K (reduction) innermost
        in_specs=[
            pl.BlockSpec((tm, tk), lambda i, kk: (i, kk)),     # x row/K tile
            pl.BlockSpec((tk, n_pad), lambda i, kk: (kk, 0)),  # W K-slab (all N)
            pl.BlockSpec((1, n_pad), lambda i, kk: (0, 0)),    # bias
        ],
        out_specs=pl.BlockSpec((tm, n_pad), lambda i, kk: (i, 0)),
        scratch_shapes=[pltpu.VMEM((tm, n_pad), jnp.float32)],
    )
    kernel = functools.partial(_pooler_kernel_ksplit, compute_dtype=compute_dtype)
    return pl.pallas_call(
        kernel,
        out_shape=jax.ShapeDtypeStruct((m_pad, n_pad), out_dtype),
        grid_spec=grid_spec,
        compiler_params=pltpu.CompilerParams(
            dimension_semantics=("parallel", "arbitrary"),
            vmem_limit_bytes=vmem_limit_bytes,
        ),
    )(x_p, w_t, b2d)


# ---------------------------------------------------------------------------
# Tile / grid planning
# ---------------------------------------------------------------------------

def _plan_tiles(m, k, n_pad, *, x_isz, w_isz, o_isz, cast_isz, budget,
                buffered_one_ok):
    """Pick grid/tile sizes.  Priorities (HBM roofline):
       1. keep the full weight resident (gn = 1) so x streams from HBM once;
       2. keep the row tile tm large (128..512) for MXU utilization and low
          per-step overhead;
       3. only then tile K (re-streams W per row tile) or N (re-reads x),
          choosing by an estimated traffic + step-overhead cost.
    Returns a plan dict, or None if nothing fits VMEM."""
    avail = max(budget - 2 * 2**20, 8 * 2**20)   # Mosaic internal-scratch headroom
    m8 = _round_up(max(m, 1), _SUBLANE)
    tm_hi = min(512, m8)
    tm_min = min(128, m8)

    def fit_tm(tk, tn, wb, acc):
        """Largest row tile (multiple of 8, <= tm_hi) that fits in `avail`.
        Counts double-buffered x and out tiles, the materialized cast temp,
        `wb` weight/bias buffers and (optionally) the f32 accumulator."""
        fixed = wb * tk * tn * w_isz + wb * _SUBLANE * tn * 4
        per_row = tk * (2 * x_isz + cast_isz) + tn * (2 * o_isz + (4 if acc else 0))
        if fixed >= avail:
            return 0
        tm = min((avail - fixed) // per_row, tm_hi)
        return int(tm // _SUBLANE * _SUBLANE)

    def cost(traffic_bytes, steps):
        # ~microseconds at ~1 TB/s HBM + ~0.35 us fixed cost per grid step.
        return traffic_bytes / 1e6 + 0.35 * steps

    wb1 = 1 if buffered_one_ok else 2

    # --- Plan 1: full weight resident, full K per step (preferred). ---------
    tm1 = fit_tm(k, n_pad, wb1, False)
    if tm1 >= tm_min:
        return dict(kind="full", tm_cap=tm1, tn=n_pad, tk=k, k_pad=k,
                    n_pad2=n_pad, wb=wb1)

    candidates = []

    if tm1 >= _SUBLANE:                      # plan 1 with a small row tile
        gm1 = pl.cdiv(m8, tm1)
        traffic = (gm1 * tm1 * k * x_isz + k * n_pad * w_isz
                   + gm1 * tm1 * n_pad * o_isz)
        candidates.append((cost(traffic, gm1),
                           dict(kind="full", tm_cap=tm1, tn=n_pad, tk=k,
                                k_pad=k, n_pad2=n_pad, wb=wb1)))

    # --- Plan 2: gn = 1, K split (f32 accumulator; W streamed per row tile). -
    k_pad = _round_up(k, _LANE)
    for tk in range(k_pad - _LANE, 0, -_LANE):
        if k_pad % tk != 0:
            continue
        tm2 = fit_tm(tk, n_pad, 2, True)
        if tm2 < tm_min:
            continue
        gk = k_pad // tk
        gm2 = pl.cdiv(m8, tm2)
        traffic = (gm2 * tm2 * k_pad * x_isz          # x streamed once
                   + gm2 * k_pad * n_pad * w_isz      # W re-streamed per row tile
                   + gm2 * tm2 * n_pad * o_isz)
        candidates.append((cost(traffic, gm2 * gk),
                           dict(kind="ksplit", tm_cap=tm2, tn=n_pad, tk=tk,
                                k_pad=k_pad, n_pad2=n_pad, wb=2)))

    # --- Plan 3: column-tiled weight (gn > 1), full K per step. -------------
    # tn is rounded UP to 128 (no divisor search); padded columns are cheap
    # MXU work and are sliced off afterwards.
    tn_cap = max(_LANE, (avail // 2) // (2 * k * w_isz) // _LANE * _LANE)
    while tn_cap >= _LANE:
        gn = pl.cdiv(n_pad, tn_cap)
        tn3 = _round_up(pl.cdiv(n_pad, gn), _LANE)
        tm3 = fit_tm(k, tn3, 2, False)
        if tm3 >= _SUBLANE:
            gm3 = pl.cdiv(m8, tm3)
            n_pad2 = gn * tn3
            traffic = (gn * gm3 * tm3 * k * x_isz     # x re-read per column tile
                       + k * n_pad2 * w_isz
                       + gm3 * tm3 * n_pad2 * o_isz)
            candidates.append((cost(traffic, gn * gm3),
                               dict(kind="full", tm_cap=tm3, tn=tn3, tk=k,
                                    k_pad=k, n_pad2=n_pad2, wb=2)))
        tn_cap = (tn_cap // 2) // _LANE * _LANE

    if not candidates:
        return None
    candidates.sort(key=lambda c: c[0])
    return candidates[0][1]


# ---------------------------------------------------------------------------
# Public wrappers
# ---------------------------------------------------------------------------

def grounded_cky_pooler_prepared(hidden_states, w_t, b2d, hidden_size, *,
                                 compute_dtype=jnp.bfloat16, out_dtype=None):
    """tanh(hidden_states @ W.T + b) with pre-prepared parameters."""
    *lead, k = hidden_states.shape
    assert w_t.shape[0] == k, "weight/input_dim mismatch"
    n_pad = w_t.shape[1]
    if out_dtype is None:
        out_dtype = hidden_states.dtype

    x2d = hidden_states.reshape(-1, k)
    m = x2d.shape[0]
    if m == 0:
        return jnp.zeros((*lead, hidden_size), out_dtype)

    x_isz = jnp.dtype(x2d.dtype).itemsize
    w_isz = jnp.dtype(w_t.dtype).itemsize
    o_isz = jnp.dtype(out_dtype).itemsize
    needs_cast = jnp.dtype(x2d.dtype) != jnp.dtype(compute_dtype)
    cast_isz = jnp.dtype(compute_dtype).itemsize if needs_cast else 0

    budget = _vmem_budget_bytes()
    plan = _plan_tiles(m, k, n_pad, x_isz=x_isz, w_isz=w_isz, o_isz=o_isz,
                       cast_isz=cast_isz, budget=budget,
                       buffered_one_ok=_buffered_one_supported())
    if plan is None:
        # TODO(synk): combined N x K second-level blocking for inputs so large
        # that no single-level plan fits VMEM; fall back to plain XLA for now.
        out = jnp.tanh(x2d.astype(compute_dtype) @ w_t + b2d).astype(out_dtype)
        return out[:, :hidden_size].reshape(*lead, hidden_size)

    # ---- row tiling: minimal M padding (<= ~8 extra rows per row tile) -----
    m8 = _round_up(m, _SUBLANE)
    gm = pl.cdiv(m8, plan["tm_cap"])
    tm = _round_up(pl.cdiv(m8, gm), _SUBLANE)
    m_pad = gm * tm

    k_pad = plan["k_pad"]
    n_pad2 = plan["n_pad2"]

    if m_pad != m or k_pad != k:
        x2d = jnp.pad(x2d, ((0, m_pad - m), (0, k_pad - k)))
    if k_pad != k:
        w_t = jnp.pad(w_t, ((0, k_pad - k), (0, 0)))
    if n_pad2 != n_pad:
        w_t = jnp.pad(w_t, ((0, 0), (0, n_pad2 - n_pad)))
        b2d = jnp.pad(b2d, ((0, 0), (0, n_pad2 - n_pad)))

    common = dict(out_dtype=out_dtype, compute_dtype=compute_dtype,
                  vmem_limit_bytes=int(budget))
    if plan["kind"] == "ksplit":
        out_p = _call_k_split(x2d, w_t, b2d, tm=tm, tk=plan["tk"], **common)
    else:
        out_p = _call_full_k(x2d, w_t, b2d, tm=tm, tn=plan["tn"],
                             wb=plan["wb"], **common)

    out = out_p[:m, :hidden_size]
    return out.reshape(*lead, hidden_size)


def grounded_cky_pooler(hidden_states, weight, bias, *,
                        compute_dtype=jnp.bfloat16, out_dtype=None):
    """Convenience wrapper taking PyTorch-layout parameters.

    hidden_states: (..., input_dim)
    weight:        (hidden_size, input_dim)   (nn.Linear layout)
    bias:          (hidden_size,)
    returns:       (..., hidden_size)

    For repeated calls, prefer prepare_pooler_params(...) once +
    grounded_cky_pooler_prepared(...) so the transpose/pad/cast is hoisted.
    """
    w_t, b2d, n = prepare_pooler_params(weight, bias, compute_dtype=compute_dtype)
    return grounded_cky_pooler_prepared(hidden_states, w_t, b2d, n,
                                        compute_dtype=compute_dtype,
                                        out_dtype=out_dtype)


# ---------------------------------------------------------------------------
# Self-test
# ---------------------------------------------------------------------------

if __name__ == "__main__":
    # Shapes consistent with the module: batch=2, seq=8, input_dim=32, hidden=32.
    batch, seq, input_dim, hidden_size = 2, 8, 32, 32

    key = jax.random.PRNGKey(0)
    k_x, k_w, k_b = jax.random.split(key, 3)

    hidden_states = jax.random.normal(k_x, (batch, seq, input_dim), jnp.float32)
    weight = jax.random.normal(k_w, (hidden_size, input_dim), jnp.float32) * 0.05
    bias = jax.random.normal(k_b, (hidden_size,), jnp.float32) * 0.01

    ref = jnp.tanh(hidden_states @ weight.T + bias)

    # Default fast path: bf16 MXU inputs, f32 accumulation / bias / tanh.
    out = jax.block_until_ready(grounded_cky_pooler(hidden_states, weight, bias))
    assert out.shape == (batch, seq, hidden_size)
    assert jnp.allclose(out, ref, atol=2e-2, rtol=2e-2), "bf16 path mismatch"

    # Full-precision path must match tightly.
    out_f32 = jax.block_until_ready(
        grounded_cky_pooler(hidden_states, weight, bias,
                            compute_dtype=jnp.float32))
    assert jnp.allclose(out_f32, ref, atol=1e-5, rtol=1e-5), "f32 path mismatch"

    # ---- exercise the large-model code paths at toy sizes ------------------
    # (a) K-split kernel (f32 VMEM accumulator, bias + tanh on the last K step).
    xk = jax.random.normal(jax.random.PRNGKey(1), (16, 256), jnp.float32)
    wk = jax.random.normal(jax.random.PRNGKey(2), (256, 128), jnp.float32) * 0.05
    bk = jax.random.normal(jax.random.PRNGKey(3), (1, 128), jnp.float32) * 0.01
    out_k = jax.block_until_ready(_call_k_split(
        xk, wk, bk, tm=8, tk=128,
        out_dtype=jnp.float32, compute_dtype=jnp.float32,
        vmem_limit_bytes=_vmem_budget_bytes()))
    ref_k = jnp.tanh(xk @ wk + bk)
    assert jnp.allclose(out_k, ref_k, atol=1e-3, rtol=1e-3), "K-split mismatch"

    # (b) Column-tiled weight (gn > 1) with double-buffered weight blocks.
    xc = jax.random.normal(jax.random.PRNGKey(4), (16, 32), jnp.float32)
    wc = jax.random.normal(jax.random.PRNGKey(5), (32, 256), jnp.float32) * 0.05
    bc = jax.random.normal(jax.random.PRNGKey(6), (1, 256), jnp.float32) * 0.01
    out_c = jax.block_until_ready(_call_full_k(
        xc, wc, bc, tm=8, tn=128, wb=2,
        out_dtype=jnp.float32, compute_dtype=jnp.float32,
        vmem_limit_bytes=_vmem_budget_bytes()))
    ref_c = jnp.tanh(xc @ wc + bc)
    assert jnp.allclose(out_c, ref_c, atol=1e-3, rtol=1e-3), "gn>1 path mismatch"

    print("KERNEL_OK")
</pallas_src>

<mosaic_0001>
module attributes {stable_mosaic.version = 11 : i64} {
  func.func @_pooler_kernel(%arg0: i32, %arg1: i32, %arg2: memref<16x32xf32, #tpu.memory_space<vmem>>, %arg3: memref<32x128xbf16, #tpu.memory_space<vmem>>, %arg4: memref<1x128xf32, #tpu.memory_space<vmem>>, %arg5: memref<16x128xf32, #tpu.memory_space<vmem>>) attributes {dimension_semantics = [#tpu.dimension_semantics<arbitrary>, #tpu.dimension_semantics<parallel>], iteration_bounds = array<i64: 1, 1>, scalar_prefetch = 0 : i64, scratch_operands = 0 : i64, tpu.core_type = #tpu.core_type<tc>, window_params = [{transform_indices = @transform_0, window_bounds = array<i64: 16, 32>}, {transform_indices = @transform_1, window_bounds = array<i64: 32, 128>}, {transform_indices = @transform_2, window_bounds = array<i64: 1, 128>}, {transform_indices = @transform_3, window_bounds = array<i64: 16, 128>}]} {
    %c0 = arith.constant 0 : index
    %c0_0 = arith.constant 0 : index
    %0 = vector.load %arg2[%c0, %c0_0] : memref<16x32xf32, #tpu.memory_space<vmem>>, vector<16x32xf32>
    %1 = arith.truncf %0 : vector<16x32xf32> to vector<16x32xbf16>
    %c0_1 = arith.constant 0 : index
    %c0_2 = arith.constant 0 : index
    %2 = vector.load %arg3[%c0_1, %c0_2] : memref<32x128xbf16, #tpu.memory_space<vmem>>, vector<32x128xbf16>
    %cst = arith.constant dense<0.000000e+00> : vector<16x128xf32>
    %3 = tpu.matmul %1, %2, %cst {dimension_numbers = #tpu.dot_dimension_numbers<[1], [0], [0], [1], [0, 0, 1, 1], [], []>} : vector<16x32xbf16>, vector<32x128xbf16>, vector<16x128xf32> -> vector<16x128xf32>
    %c0_3 = arith.constant 0 : index
    %c0_4 = arith.constant 0 : index
    %4 = vector.load %arg4[%c0_3, %c0_4] : memref<1x128xf32, #tpu.memory_space<vmem>>, vector<1x128xf32>
    %5 = vector.broadcast %4 : vector<1x128xf32> to vector<16x128xf32>
    %6 = arith.addf %3, %5 : vector<16x128xf32>
    %7 = math.tanh %6 : vector<16x128xf32>
    %c0_5 = arith.constant 0 : index
    %c0_6 = arith.constant 0 : index
    %8 = vector.load %arg5[%c0_5, %c0_6] : memref<16x128xf32, #tpu.memory_space<vmem>>, vector<16x128xf32>
    tpu.vector_store %arg5[%c0_5, %c0_6], %7 {strides = array<i32>} : memref<16x128xf32, #tpu.memory_space<vmem>>, vector<16x128xf32>,
    return
  }
  func.func @transform_0(%arg0: i32, %arg1: i32) -> (i32, i32) {
    %c0_i32 = arith.constant 0 : i32
    %c0_i32_0 = arith.constant 0 : i32
    return %arg1, %c0_i32 : i32, i32
  }
  func.func @transform_1(%arg0: i32, %arg1: i32) -> (i32, i32) {
    %c0_i32 = arith.constant 0 : i32
    %c0_i32_0 = arith.constant 0 : i32
    return %c0_i32, %arg0 : i32, i32
  }
  func.func @transform_2(%arg0: i32, %arg1: i32) -> (i32, i32) {
    %c0_i32 = arith.constant 0 : i32
    %c0_i32_0 = arith.constant 0 : i32
    return %c0_i32, %arg0 : i32, i32
  }
  func.func @transform_3(%arg0: i32, %arg1: i32) -> (i32, i32) {
    %c0_i32 = arith.constant 0 : i32
    return %arg1, %arg0 : i32, i32
  }
}

</mosaic_0001>

<bundles_post_ra>
// kernel: tpu_custom_call.1
= control target key start
LH: loop header
LB: loop body
LE: loop exit
PB: predicated region body
PF: predicated region fallthrough
CT: control target
= control target key end

     0   :  { %8 = vsyncpa [#allocation3], 0  ;;  %s259_s0 = inlined_call_operand.hbm [shape: f32[16,32], index: 0, kind: input, shape index: {}]   ;;  %s260_s1 = inlined_call_operand.hbm [shape: bf16[32,128], index: 1, kind: input, shape index: {}]   ;;  %s261_s2 = inlined_call_operand.vmem [shape: f32[1,128], index: 2, kind: input, shape index: {}]   ;;  %s262_s3 = inlined_call_operand.hbm [shape: f32[16,128], index: 3, kind: output, shape index: {}]  }
   0x1   :  { %9 = vsyncpa [#allocation6], 0 }
   0x2   :  { %10 = vsyncpa [#allocation4], 0  ;;  %s15_s14 = sshll.u32 %s259_s0, 4  ;;  %s214_s15 = smov [#allocation2]   ;;  %s16_s14 = int_to_ptr.hbm [resolvable:$true] %s15_s14 }
   0x3   :  { %s17_s16 = sshll.u32 %s214_s15, 4  ;;  %s28_s19 = sshll.u32 %s260_s1, 4  ;;  %s18_s16 = int_to_ptr.vmem [resolvable:$true] %s17_s16  ;;  %s29_s19 = int_to_ptr.hbm [resolvable:$true] %s28_s19 }
   0x4   :  { %s215_s20 = smov 128   ;;  %s216_s21 = smov 8  }
   0x5   :  { %23 = dma.hbm_to_vmem [thread:$0]  %s16_s14, 256, %s18_s16, [#allocation3], %s215_s20, %s215_s20, %s216_s21  }
   0x6   :  { %s217_s22 = smov [#allocation5]   ;;  %s218_s24 = smov 64  }
   0x7   :  { %s30_s23 = sshll.u32 %s217_s22, 4  ;;  %s219_s0 = smov 4   ;;  %s31_s23 = int_to_ptr.vmem [resolvable:$true] %s30_s23 }
   0x8   :  { %36 = dma.hbm_to_vmem [thread:$0]  %s29_s19, 256, %s31_s23, [#allocation6], %s218_s24, %s218_s24, %s219_s0  }
   0x9   :  { %208 = dma.done.wait [#allocation3], 256  }
   0xa   :  { %209 = vsyncadd [#allocation3], 4294967040 }
   0xb   :  { %210 = dma.done.wait [#allocation6], 256  }
   0xc   :  { %211 = vsyncadd [#allocation6], 4294967040  ;;  %v123_v0 = vld [vmem:[#allocation5 + $0x8] sm:$0xff]  ;;  %v122_v1 = vld [vmem:[#allocation5] sm:$0xff]  ;;  %vm71_vm0 = vcmask 261120   ;;  %s220_s26 = smov [#allocation7]  }
   0xd   :  { %81 = vmatpush.bf16.msra.mxu0 %v123_v0  ;;  %v48_v2 = vld [vmem:[#allocation2] sm:$0xff]  ;;  %v49_v3 = vld [vmem:[#allocation2 + $0x8] sm:$0xff]  ;;  %s97_s27 = sshll.u32 %s220_s26, 4  ;;  %s99_s30 = sshll.u32 %s262_s3, 4  ;;  %s98_s27 = int_to_ptr.vmem [resolvable:$true] %s97_s27  ;;  %s100_s30 = int_to_ptr.hbm [resolvable:$true] %s99_s30 }
   0xe   :  { %v50_v4 = vpack.c.bf16 %v49_v3, %v48_v2  ;;  %v131_v5 = vld [vmem:[%s261_s2] ss:$0 sm:$0xff] }
  0x11   :  { %82 = vmatpush.bf16.msra.mxu0 %v122_v1 }
  0x14   :  { %121 = vmatmul.msk.bf16.vlgmr.msra.gmra.mxu0 %vm71_vm0, %v50_v4 }
  0x91   :  { %v84_v6 = vpop.f32.mrf.mxu0 }
  0x92   :  { %v85_v7 = vadd.f32 %v131_v5, %v84_v6 }
  0x94   :  { %132 = vtanh.f32 %v85_v7 }
  0x99   :  { %v86_v8 = vpop.f32.mrf.mxu0 }
  0x9a   :  { %v133_v9 = vpop.eup %132  ;;  %v87_v10 = vadd.f32 %v131_v5, %v86_v8 }
  0x9b   :  { %91 = vst [vmem:[#allocation7] sm:$0xff] %v133_v9 }
  0x9c   :  { %134 = vtanh.f32 %v87_v10 }
  0xa2   :  { %v135_v11 = vpop.eup %134 }
  0xa3   :  { %92 = vst [vmem:[#allocation7 + $0x8] sm:$0xff] %v135_v11 }
  0xa4   :  { %105 = dma.vmem_to_hbm [thread:$0]  %s98_s27, 256, %s100_s30, [#allocation4], %s215_s20, %s215_s20, %s216_s21  }
  0xa5   :  { %212 = dma.done.wait [#allocation4], 256  }
  0xa6   :  { %213 = vsyncadd [#allocation4], 4294967040 }
  0xa7   :  { %110 = vsyncpa [#allocation3], 1 }
  0xa8   :  { %111 = vsyncpa [#allocation6], 1 }
  0xa9   :  { %112 = vsyncpa [#allocation4], 1 }

</bundles_post_ra>
